<compile_context>
chip_gen: v5e
topology: v5e:2x2
jax: 0.10.0
libtpu: 0.0.40
codegen_flags: <defaults>
</compile_context>

<pallas_src>
import math

import numpy as np

import jax
import jax.numpy as jnp
from jax import lax
from jax.experimental import pallas as pl
from jax.experimental.pallas import tpu as pltpu  # noqa: F401  (kept for parity)

# ----------------------------- configuration --------------------------------
HIDDEN = 32
NUM_HEADS = 2
NUM_MEM = 4          # num_memories
TOPK = 2
CAPACITY = 0.5       # chosen so capacity_len <= seq*topk/num_mem (pigeonhole)
                     # => max_len == capacity_len is static
KEY_DIM = HIDDEN     # expand_k = 1
VALUE_DIM = HIDDEN   # expand_v = 1
HEAD_QK = KEY_DIM // NUM_HEADS    # 16
HEAD_V = VALUE_DIM // NUM_HEADS   # 16
NORM_EPS = 1e-5
ATTN_SCALE = HEAD_QK ** -0.5      # fla chunk_linear_attn default scale (applied to q)

BATCH = 2
SEQ = 8

CAP_LEN = math.ceil(SEQ / TOPK * CAPACITY)   # 2, static max_len (see note below)
N_SRC = NUM_MEM * BATCH * CAP_LEN            # 16 expert-slot rows, (e, b, t) order
N_TOK = BATCH * SEQ                          # 16 original tokens
WIDE = NUM_MEM * KEY_DIM                     # 128: all experts side-by-side in lanes

# NOTE: the torch `transform` computes max_len dynamically.  CAPACITY is chosen
# so capacity_len always lower-bounds the per-memory max (pigeonhole), making
# max_len == capacity_len static.  The equivalence also relies on the
# HadamardFeatureMap biases being zero-initialized (padded/empty rows stay 0).


# --------------------------- static mask tables ------------------------------
def _build_static_masks():
    r = np.arange(N_SRC)
    grp = r // CAP_LEN                           # (expert, batch) group, E-major rows
    pos = r % CAP_LEN
    bmask = ((grp[:, None] == grp[None, :]) &
             (pos[:, None] >= pos[None, :])).astype(np.float32)       # (N_SRC, N_SRC)

    e_of_r = r // (BATCH * CAP_LEN)
    lane = np.arange(WIDE)
    blk, sub = lane // KEY_DIM, lane % KEY_DIM
    selhm = np.stack([
        ((blk[None, :] == e_of_r[:, None]) &
         (sub[None, :] >= h * HEAD_QK) & (sub[None, :] < (h + 1) * HEAD_QK)
         ).astype(np.float32)
        for h in range(NUM_HEADS)])              # (NUM_HEADS, N_SRC, WIDE)

    # collapse expert-wide lanes back to VALUE_DIM lanes (sum of the E blocks;
    # at most one block per row is nonzero after masking)
    rmat = np.tile(np.eye(VALUE_DIM, dtype=np.float32), (NUM_MEM, 1))  # (WIDE, V)
    return bmask, selhm, rmat


BMASK_NP, SELHM_NP, RMAT_NP = _build_static_masks()


# ------------------------------ Pallas kernel --------------------------------
def fused_mom_kernel(x_ref, p_ref, g_ref, bmask_ref, selhm_ref, rmat_ref,
                     ww_ref, wn_ref, o_ref):
    """Fully fused MoM linear attention, single un-gridded invocation.

    x_ref:    (N_TOK, HIDDEN)          raw hidden states
    p_ref:    (N_SRC, N_TOK)           transform gather matrix (mask folded in)
    g_ref:    (N_TOK, N_SRC)           reconstruct mix matrix (mask + routing
                                       weights + top-k sum folded in)
    bmask_ref:(N_SRC, N_SRC)           same-expert & same-batch & causal mask
    selhm_ref:(NUM_HEADS, N_SRC, WIDE) per-row expert-block x head lane selects
    rmat_ref: (WIDE, VALUE_DIM)        expert-wide -> narrow lane collapse
    ww_ref:   (5, HIDDEN, WIDE)        [q.fm1, q.fm2 (scale folded, expert-tiled),
                                        k.fm1, k.fm2, v] expert-wide weights
    wn_ref:   (2, VALUE_DIM, HIDDEN)   [hmat (per-head mean matrix), wo (gain folded)]
    o_ref:    (N_TOK, HIDDEN)
    """
    f32 = jnp.float32
    x = x_ref[...]                                                      # (N_TOK, D)

    # transform: gather tokens into (expert, batch, time) rows, on the MXU
    xt = jnp.dot(p_ref[...], x, preferred_element_type=f32)             # (N_SRC, D)

    # projections + Hadamard feature maps, all experts side-by-side in lanes
    qf = (jnp.dot(xt, ww_ref[0], preferred_element_type=f32) *
          jnp.dot(xt, ww_ref[1], preferred_element_type=f32))           # (N_SRC, WIDE)
    kf = (jnp.dot(xt, ww_ref[2], preferred_element_type=f32) *
          jnp.dot(xt, ww_ref[3], preferred_element_type=f32))           # (N_SRC, WIDE)
    vw = jnp.dot(xt, ww_ref[4], preferred_element_type=f32)             # (N_SRC, WIDE)

    bmask = bmask_ref[...]
    m0 = selhm_ref[0]
    m1 = selhm_ref[1]

    def dot_t(a, b):  # a @ b.T via contracting dims (no materialized transpose)
        return lax.dot_general(a, b, (((1,), (1,)), ((), ())),
                               preferred_element_type=f32)

    # per-head block-causal linear attention; expert selection happens through
    # the static lane masks (qf is expert-tiled, kf/vw are expert-blocked)
    s0 = dot_t(qf, kf * m0) * bmask                                      # (N_SRC, N_SRC)
    s1 = dot_t(qf, kf * m1) * bmask
    ow = (jnp.dot(s0, vw * m0, preferred_element_type=f32) +
          jnp.dot(s1, vw * m1, preferred_element_type=f32))              # (N_SRC, WIDE)
    out = jnp.dot(ow, rmat_ref[...], preferred_element_type=f32)         # (N_SRC, V)

    # reconstruct: masked scatter-add + routing weights + top-k sum == G @ out
    y = jnp.dot(g_ref[...], out, preferred_element_type=f32)             # (N_TOK, V)

    # per-head RMSNorm (per-head mean via block matmul) + o_proj (gain folded)
    ms = jnp.dot(y * y, wn_ref[0], preferred_element_type=f32)
    yn = y * lax.rsqrt(ms + NORM_EPS)
    o_ref[...] = jnp.dot(yn, wn_ref[1], preferred_element_type=f32).astype(o_ref.dtype)


def fused_mom_attention(x2d, pmat, gmat, params):
    """x2d: (N_TOK, HIDDEN) -> (N_TOK, HIDDEN).  Single un-gridded pallas_call."""
    return pl.pallas_call(
        fused_mom_kernel,
        out_shape=jax.ShapeDtypeStruct((N_TOK, HIDDEN), x2d.dtype),
    )(x2d, pmat, gmat,
      jnp.asarray(BMASK_NP), jnp.asarray(SELHM_NP), jnp.asarray(RMAT_NP),
      params["w_wide"], params["w_norm"])


# ----------------------- routing / index bookkeeping -------------------------
def transform_indices(routing_mask, selected_memories):
    """Index bookkeeping of mom `transform` (no data movement; static max_len)."""
    B, S, _ = routing_mask.shape
    topk = selected_memories.shape[2]
    s_rep = S * topk
    sel = selected_memories.reshape(B, s_rep).astype(jnp.int32)

    batch_indices = jnp.repeat(jnp.arange(B, dtype=jnp.int32), s_rep)
    memories_flat = sel.reshape(-1)
    # static multiplier (NUM_MEM) gives the same ordering as max()+1
    combined = batch_indices * NUM_MEM + memories_flat
    # stable sort preserves temporal order within a (batch, memory) group
    sorted_indices = jnp.argsort(combined, stable=True)               # (B*s_rep,)

    batch_memory_tokens = routing_mask.sum(axis=1)                    # (B, M)
    offset = jnp.cumsum(batch_memory_tokens, axis=1)
    memory_batch_offset = offset.T + jnp.arange(0, B * s_rep, s_rep, dtype=offset.dtype)
    flatten_offset = memory_batch_offset.T.reshape(-1)                # (B*M,)

    seg_start = jnp.concatenate(
        [jnp.zeros((1,), flatten_offset.dtype), flatten_offset[:-1]])
    idx = jnp.arange(CAP_LEN, dtype=flatten_offset.dtype)[None, :] + seg_start[:, None]
    trunc = idx + batch_memory_tokens.reshape(-1)[:, None] - CAP_LEN
    mask = (trunc < flatten_offset[:, None]) & (trunc >= 0) & (trunc >= seg_start[:, None])
    trunc = jnp.where(mask, trunc, jnp.zeros_like(trunc))
    return trunc, mask, sorted_indices


def build_gather_mix(trunc, mask, sorted_indices, routing_weights):
    """Fold transform's gather and reconstruct's masked scatter-add + routing
    weights + top-k sum into two tiny mix matrices consumed on the MXU."""
    B, S, topk = routing_weights.shape
    n_rep = B * S * topk
    dt = routing_weights.dtype

    # reorder rows (b, e, t) -> (e, b, t) to match the kernel's expert-major rows
    trunc_e = jnp.transpose(trunc.reshape(B, NUM_MEM, CAP_LEN), (1, 0, 2)).reshape(N_SRC)
    valid_e = jnp.transpose(mask.reshape(B, NUM_MEM, CAP_LEN), (1, 0, 2)).reshape(N_SRC)
    valid_e = valid_e.astype(dt)

    # P: source row r gathers original token sorted_indices[trunc_e[r]] // topk
    tok_r = (sorted_indices // topk).astype(jnp.int32)[trunc_e]
    pmat = (tok_r[:, None] == jnp.arange(B * S, dtype=jnp.int32)[None, :]).astype(dt)
    pmat = pmat * valid_e[:, None]

    # G: masked scatter-add back to (b, s, k) slots, weight, sum over top-k
    # (mask is applied BEFORE the scatter, matching torch reconstruct)
    onehot = (trunc_e[:, None] ==
              jnp.arange(n_rep, dtype=trunc_e.dtype)[None, :]).astype(dt)
    onehot = onehot * valid_e[:, None]                                 # sorted-space cols
    inverse_indices = jnp.argsort(sorted_indices, stable=True)
    a = onehot[:, inverse_indices] * routing_weights.reshape(-1)[None, :]
    gmat = a.reshape(N_SRC, B * S, topk).sum(axis=-1).T                # (N_TOK, N_SRC)
    return pmat, gmat


# ------------------------------ forward --------------------------------------
def mom_linear_attention_forward(x, params):
    B, S, _ = x.shape
    router_logits = jnp.einsum("bsd,md->bsm", x, params["gate"])
    scores = jax.nn.softmax(router_logits.astype(jnp.float32), axis=2)
    routing_weights, selected_memories = lax.top_k(scores, TOPK)
    routing_weights = routing_weights / routing_weights.sum(axis=-1, keepdims=True)
    routing_weights = routing_weights.astype(x.dtype)

    bidx = jnp.arange(B)[:, None, None]
    sidx = jnp.arange(S)[None, :, None]
    rw_full = jnp.zeros((B, S, NUM_MEM), routing_weights.dtype)
    rw_full = rw_full.at[bidx, sidx, selected_memories].set(routing_weights)
    routing_mask = (rw_full != 0).astype(jnp.int32)

    # TODO(synk): router softmax/top-k and this argsort/cumsum bookkeeping stay
    # in plain JAX (data-dependent index glue that produces the P/G matrices).
    trunc, mask, sorted_indices = transform_indices(routing_mask, selected_memories)
    pmat, gmat = build_gather_mix(trunc, mask, sorted_indices, routing_weights)

    o2d = fused_mom_attention(x.reshape(B * S, HIDDEN), pmat, gmat, params)
    return o2d.reshape(B, S, HIDDEN), router_logits


# ------------------------------ parameters ------------------------------------
def init_params(key):
    gain = 2.0 ** (-2.5)
    keys = jax.random.split(key, 9)

    def xavier(k, shape):
        fan_out, fan_in = shape[-2], shape[-1]
        bound = gain * math.sqrt(6.0 / (fan_in + fan_out))
        return jax.random.uniform(k, shape, jnp.float32, -bound, bound)

    # torch-layout weights (out, in), then packed / pre-transposed for the kernel
    gate = xavier(keys[0], (NUM_MEM, HIDDEN))
    wq = xavier(keys[1], (KEY_DIM, HIDDEN))
    wk = xavier(keys[2], (NUM_MEM, KEY_DIM, HIDDEN))
    wv = xavier(keys[3], (NUM_MEM, VALUE_DIM, HIDDEN))
    fq1 = xavier(keys[4], (HEAD_QK, HEAD_QK))
    fq2 = xavier(keys[5], (HEAD_QK, HEAD_QK))
    fk1 = xavier(keys[6], (HEAD_QK, HEAD_QK))
    fk2 = xavier(keys[7], (HEAD_QK, HEAD_QK))
    wo = xavier(keys[8], (HIDDEN, VALUE_DIM))
    rms_g = jnp.ones((HEAD_V,), jnp.float32)

    eye_h = jnp.eye(NUM_HEADS, dtype=jnp.float32)

    def head_packed(w):  # (h,h) torch (out,in) -> (K,K) block-diag, (in,out) layout
        return jnp.kron(eye_h, w.T)

    # q projection folded into both q feature-map factors; sqrt(scale) folded
    # into each factor.  HadamardFeatureMap biases are zero-initialized by the
    # module and therefore dropped (they would also have to be sqrt-scaled).
    sqrt_scale = ATTN_SCALE ** 0.5
    wq_t = wq.T                                                  # (HIDDEN, KEY_DIM)
    wq1 = (wq_t @ head_packed(fq1)) * sqrt_scale
    wq2 = (wq_t @ head_packed(fq2)) * sqrt_scale

    # per-expert k projections folded into the k feature maps; v pre-transposed
    wk_t = jnp.transpose(wk, (0, 2, 1))                          # (E, HIDDEN, KEY_DIM)
    wk1 = jnp.einsum("edk,kj->edj", wk_t, head_packed(fk1))
    wk2 = jnp.einsum("edk,kj->edj", wk_t, head_packed(fk2))
    wv_t = jnp.transpose(wv, (0, 2, 1))                          # (E, HIDDEN, VALUE_DIM)

    def widen(per_expert):  # (E, D, K) -> (D, E*K): expert e lives in lane block e
        return jnp.transpose(per_expert, (1, 0, 2)).reshape(HIDDEN, WIDE)

    w_wide = jnp.stack([
        jnp.tile(wq1, (1, NUM_MEM)),        # q is shared across experts -> tiled
        jnp.tile(wq2, (1, NUM_MEM)),
        widen(wk1), widen(wk2), widen(wv_t)])                    # (5, HIDDEN, WIDE)

    # per-head mean matrix for RMSNorm: (y*y) @ hmat broadcasts each head's
    # mean(y^2) to that head's lanes; RMS gain folded into o_proj.
    hmat = jnp.kron(eye_h, jnp.full((HEAD_V, HEAD_V), 1.0 / HEAD_V, jnp.float32))
    g_tiled = jnp.tile(rms_g, NUM_HEADS)                         # (VALUE_DIM,)
    wo_g = g_tiled[:, None] * wo.T                               # (VALUE_DIM, HIDDEN)
    w_norm = jnp.stack([hmat, wo_g])                             # (2, VALUE_DIM, HIDDEN)

    return {"gate": gate, "w_wide": w_wide, "w_norm": w_norm}


if __name__ == "__main__":
    key = jax.random.PRNGKey(0)
    kx, kp = jax.random.split(key)
    x = jax.random.normal(kx, (BATCH, SEQ, HIDDEN), jnp.float32)
    params = init_params(kp)

    fwd = jax.jit(mom_linear_attention_forward)
    o, router_logits = fwd(x, params)
    jax.block_until_ready((o, router_logits))

    assert o.shape == (BATCH, SEQ, HIDDEN)
    assert router_logits.shape == (BATCH, SEQ, NUM_MEM)
    assert bool(jnp.all(jnp.isfinite(o)))
    print("KERNEL_OK")
</pallas_src>

<mosaic_0001>
module attributes {stable_mosaic.version = 11 : i64} {
  func.func @fused_mom_kernel(%arg0: memref<16x32xf32, #tpu.memory_space<vmem>>, %arg1: memref<16x16xf32, #tpu.memory_space<vmem>>, %arg2: memref<16x16xf32, #tpu.memory_space<vmem>>, %arg3: memref<16x16xf32, #tpu.memory_space<vmem>>, %arg4: memref<2x16x128xf32, #tpu.memory_space<vmem>>, %arg5: memref<128x32xf32, #tpu.memory_space<vmem>>, %arg6: memref<5x32x128xf32, #tpu.memory_space<vmem>>, %arg7: memref<2x32x32xf32, #tpu.memory_space<vmem>>, %arg8: memref<16x32xf32, #tpu.memory_space<vmem>>) attributes {dimension_semantics = [], scalar_prefetch = 0 : i64, scratch_operands = 0 : i64, tpu.core_type = #tpu.core_type<tc>} {
    %c0 = arith.constant 0 : index
    %c0_0 = arith.constant 0 : index
    %0 = vector.load %arg0[%c0, %c0_0] : memref<16x32xf32, #tpu.memory_space<vmem>>, vector<16x32xf32>
    %c0_1 = arith.constant 0 : index
    %c0_2 = arith.constant 0 : index
    %1 = vector.load %arg1[%c0_1, %c0_2] : memref<16x16xf32, #tpu.memory_space<vmem>>, vector<16x16xf32>
    %cst = arith.constant dense<0.000000e+00> : vector<16x32xf32>
    %2 = tpu.matmul %1, %0, %cst {dimension_numbers = #tpu.dot_dimension_numbers<[1], [0], [0], [1], [0, 0, 1, 1], [], []>} : vector<16x16xf32>, vector<16x32xf32>, vector<16x32xf32> -> vector<16x32xf32>
    %c0_3 = arith.constant 0 : index
    %c0_4 = arith.constant 0 : index
    %c0_5 = arith.constant 0 : index
    %3 = vector.load %arg6[%c0_3, %c0_4, %c0_5] : memref<5x32x128xf32, #tpu.memory_space<vmem>>, vector<1x32x128xf32>
    %4 = vector.shape_cast %3 : vector<1x32x128xf32> to vector<32x128xf32>
    %cst_6 = arith.constant dense<0.000000e+00> : vector<16x128xf32>
    %5 = tpu.matmul %2, %4, %cst_6 {dimension_numbers = #tpu.dot_dimension_numbers<[1], [0], [0], [1], [0, 0, 1, 1], [], []>} : vector<16x32xf32>, vector<32x128xf32>, vector<16x128xf32> -> vector<16x128xf32>
    %c1 = arith.constant 1 : index
    %c0_7 = arith.constant 0 : index
    %c0_8 = arith.constant 0 : index
    %6 = vector.load %arg6[%c1, %c0_7, %c0_8] : memref<5x32x128xf32, #tpu.memory_space<vmem>>, vector<1x32x128xf32>
    %7 = vector.shape_cast %6 : vector<1x32x128xf32> to vector<32x128xf32>
    %cst_9 = arith.constant dense<0.000000e+00> : vector<16x128xf32>
    %8 = tpu.matmul %2, %7, %cst_9 {dimension_numbers = #tpu.dot_dimension_numbers<[1], [0], [0], [1], [0, 0, 1, 1], [], []>} : vector<16x32xf32>, vector<32x128xf32>, vector<16x128xf32> -> vector<16x128xf32>
    %9 = arith.mulf %5, %8 : vector<16x128xf32>
    %c2 = arith.constant 2 : index
    %c0_10 = arith.constant 0 : index
    %c0_11 = arith.constant 0 : index
    %10 = vector.load %arg6[%c2, %c0_10, %c0_11] : memref<5x32x128xf32, #tpu.memory_space<vmem>>, vector<1x32x128xf32>
    %11 = vector.shape_cast %10 : vector<1x32x128xf32> to vector<32x128xf32>
    %cst_12 = arith.constant dense<0.000000e+00> : vector<16x128xf32>
    %12 = tpu.matmul %2, %11, %cst_12 {dimension_numbers = #tpu.dot_dimension_numbers<[1], [0], [0], [1], [0, 0, 1, 1], [], []>} : vector<16x32xf32>, vector<32x128xf32>, vector<16x128xf32> -> vector<16x128xf32>
    %c3 = arith.constant 3 : index
    %c0_13 = arith.constant 0 : index
    %c0_14 = arith.constant 0 : index
    %13 = vector.load %arg6[%c3, %c0_13, %c0_14] : memref<5x32x128xf32, #tpu.memory_space<vmem>>, vector<1x32x128xf32>
    %14 = vector.shape_cast %13 : vector<1x32x128xf32> to vector<32x128xf32>
    %cst_15 = arith.constant dense<0.000000e+00> : vector<16x128xf32>
    %15 = tpu.matmul %2, %14, %cst_15 {dimension_numbers = #tpu.dot_dimension_numbers<[1], [0], [0], [1], [0, 0, 1, 1], [], []>} : vector<16x32xf32>, vector<32x128xf32>, vector<16x128xf32> -> vector<16x128xf32>
    %16 = arith.mulf %12, %15 : vector<16x128xf32>
    %c4 = arith.constant 4 : index
    %c0_16 = arith.constant 0 : index
    %c0_17 = arith.constant 0 : index
    %17 = vector.load %arg6[%c4, %c0_16, %c0_17] : memref<5x32x128xf32, #tpu.memory_space<vmem>>, vector<1x32x128xf32>
    %18 = vector.shape_cast %17 : vector<1x32x128xf32> to vector<32x128xf32>
    %cst_18 = arith.constant dense<0.000000e+00> : vector<16x128xf32>
    %19 = tpu.matmul %2, %18, %cst_18 {dimension_numbers = #tpu.dot_dimension_numbers<[1], [0], [0], [1], [0, 0, 1, 1], [], []>} : vector<16x32xf32>, vector<32x128xf32>, vector<16x128xf32> -> vector<16x128xf32>
    %c0_19 = arith.constant 0 : index
    %c0_20 = arith.constant 0 : index
    %20 = vector.load %arg3[%c0_19, %c0_20] : memref<16x16xf32, #tpu.memory_space<vmem>>, vector<16x16xf32>
    %c0_21 = arith.constant 0 : index
    %c0_22 = arith.constant 0 : index
    %c0_23 = arith.constant 0 : index
    %21 = vector.load %arg4[%c0_21, %c0_22, %c0_23] : memref<2x16x128xf32, #tpu.memory_space<vmem>>, vector<1x16x128xf32>
    %22 = vector.shape_cast %21 : vector<1x16x128xf32> to vector<16x128xf32>
    %c1_24 = arith.constant 1 : index
    %c0_25 = arith.constant 0 : index
    %c0_26 = arith.constant 0 : index
    %23 = vector.load %arg4[%c1_24, %c0_25, %c0_26] : memref<2x16x128xf32, #tpu.memory_space<vmem>>, vector<1x16x128xf32>
    %24 = vector.shape_cast %23 : vector<1x16x128xf32> to vector<16x128xf32>
    %25 = arith.mulf %16, %22 : vector<16x128xf32>
    %cst_27 = arith.constant dense<0.000000e+00> : vector<16x16xf32>
    %26 = tpu.matmul %9, %25, %cst_27 {dimension_numbers = #tpu.dot_dimension_numbers<[1], [1], [0], [0], [0, 0, 1, 0], [], []>} : vector<16x128xf32>, vector<16x128xf32>, vector<16x16xf32> -> vector<16x16xf32>
    %27 = arith.mulf %26, %20 : vector<16x16xf32>
    %28 = arith.mulf %16, %24 : vector<16x128xf32>
    %cst_28 = arith.constant dense<0.000000e+00> : vector<16x16xf32>
    %29 = tpu.matmul %9, %28, %cst_28 {dimension_numbers = #tpu.dot_dimension_numbers<[1], [1], [0], [0], [0, 0, 1, 0], [], []>} : vector<16x128xf32>, vector<16x128xf32>, vector<16x16xf32> -> vector<16x16xf32>
    %30 = arith.mulf %29, %20 : vector<16x16xf32>
    %31 = arith.mulf %19, %22 : vector<16x128xf32>
    %cst_29 = arith.constant dense<0.000000e+00> : vector<16x128xf32>
    %32 = tpu.matmul %27, %31, %cst_29 {dimension_numbers = #tpu.dot_dimension_numbers<[1], [0], [0], [1], [0, 0, 1, 1], [], []>} : vector<16x16xf32>, vector<16x128xf32>, vector<16x128xf32> -> vector<16x128xf32>
    %33 = arith.mulf %19, %24 : vector<16x128xf32>
    %cst_30 = arith.constant dense<0.000000e+00> : vector<16x128xf32>
    %34 = tpu.matmul %30, %33, %cst_30 {dimension_numbers = #tpu.dot_dimension_numbers<[1], [0], [0], [1], [0, 0, 1, 1], [], []>} : vector<16x16xf32>, vector<16x128xf32>, vector<16x128xf32> -> vector<16x128xf32>
    %35 = arith.addf %32, %34 : vector<16x128xf32>
    %c0_31 = arith.constant 0 : index
    %c0_32 = arith.constant 0 : index
    %36 = vector.load %arg5[%c0_31, %c0_32] : memref<128x32xf32, #tpu.memory_space<vmem>>, vector<128x32xf32>
    %cst_33 = arith.constant dense<0.000000e+00> : vector<16x32xf32>
    %37 = tpu.matmul %35, %36, %cst_33 {dimension_numbers = #tpu.dot_dimension_numbers<[1], [0], [0], [1], [0, 0, 1, 1], [], []>} : vector<16x128xf32>, vector<128x32xf32>, vector<16x32xf32> -> vector<16x32xf32>
    %c0_34 = arith.constant 0 : index
    %c0_35 = arith.constant 0 : index
    %38 = vector.load %arg2[%c0_34, %c0_35] : memref<16x16xf32, #tpu.memory_space<vmem>>, vector<16x16xf32>
    %cst_36 = arith.constant dense<0.000000e+00> : vector<16x32xf32>
    %39 = tpu.matmul %38, %37, %cst_36 {dimension_numbers = #tpu.dot_dimension_numbers<[1], [0], [0], [1], [0, 0, 1, 1], [], []>} : vector<16x16xf32>, vector<16x32xf32>, vector<16x32xf32> -> vector<16x32xf32>
    %40 = arith.mulf %39, %39 : vector<16x32xf32>
    %c0_37 = arith.constant 0 : index
    %c0_38 = arith.constant 0 : index
    %c0_39 = arith.constant 0 : index
    %41 = vector.load %arg7[%c0_37, %c0_38, %c0_39] : memref<2x32x32xf32, #tpu.memory_space<vmem>>, vector<1x32x32xf32>
    %42 = vector.shape_cast %41 : vector<1x32x32xf32> to vector<32x32xf32>
    %cst_40 = arith.constant dense<0.000000e+00> : vector<16x32xf32>
    %43 = tpu.matmul %40, %42, %cst_40 {dimension_numbers = #tpu.dot_dimension_numbers<[1], [0], [0], [1], [0, 0, 1, 1], [], []>} : vector<16x32xf32>, vector<32x32xf32>, vector<16x32xf32> -> vector<16x32xf32>
    %cst_41 = arith.constant 9.99999974E-6 : f32
    %44 = vector.broadcast %cst_41 : f32 to vector<16x32xf32>
    %45 = arith.addf %43, %44 : vector<16x32xf32>
    %46 = math.rsqrt %45 : vector<16x32xf32>
    %47 = arith.mulf %39, %46 : vector<16x32xf32>
    %c1_42 = arith.constant 1 : index
    %c0_43 = arith.constant 0 : index
    %c0_44 = arith.constant 0 : index
    %48 = vector.load %arg7[%c1_42, %c0_43, %c0_44] : memref<2x32x32xf32, #tpu.memory_space<vmem>>, vector<1x32x32xf32>
    %49 = vector.shape_cast %48 : vector<1x32x32xf32> to vector<32x32xf32>
    %cst_45 = arith.constant dense<0.000000e+00> : vector<16x32xf32>
    %50 = tpu.matmul %47, %49, %cst_45 {dimension_numbers = #tpu.dot_dimension_numbers<[1], [0], [0], [1], [0, 0, 1, 1], [], []>} : vector<16x32xf32>, vector<32x32xf32>, vector<16x32xf32> -> vector<16x32xf32>
    %c0_46 = arith.constant 0 : index
    %c0_47 = arith.constant 0 : index
    %51 = vector.load %arg8[%c0_46, %c0_47] : memref<16x32xf32, #tpu.memory_space<vmem>>, vector<16x32xf32>
    tpu.vector_store %arg8[%c0_46, %c0_47], %50 {strides = array<i32>} : memref<16x32xf32, #tpu.memory_space<vmem>>, vector<16x32xf32>,
    return
  }
}

</mosaic_0001>

<bundles_post_ra>
// kernel: mom_linear_attention_forward.1
= control target key start
LH: loop header
LB: loop body
LE: loop exit
PB: predicated region body
PF: predicated region fallthrough
CT: control target
= control target key end

     0   :  { %vm34_vm0 = vcmask 130048   ;;  %s842_s0 = inlined_call_operand.vmem [shape: f32[16,32], index: 0, kind: input, shape index: {}]   ;;  %s843_s1 = inlined_call_operand.vmem [shape: f32[16,16], index: 1, kind: input, shape index: {}]   ;;  %s844_s2 = inlined_call_operand.vmem [shape: f32[16,16], index: 2, kind: input, shape index: {}]   ;;  %s845_s3 = inlined_call_operand.vmem [shape: f32[16,16], index: 3, kind: input, shape index: {}]   ;;  %s846_s4 = inlined_call_operand.vmem [shape: f32[2,16,128], index: 4, kind: input, shape index: {}]   ;;  %s847_s5 = inlined_call_operand.vmem [shape: f32[128,32], index: 5, kind: input, shape index: {}]   ;;  %s848_s6 = inlined_call_operand.vmem [shape: f32[5,32,128], index: 6, kind: input, shape index: {}]   ;;  %s849_s7 = inlined_call_operand.vmem [shape: f32[2,32,32], index: 7, kind: input, shape index: {}]   ;;  %s850_s8 = inlined_call_operand.hbm [shape: f32[16,32], index: 8, kind: output, shape index: {}]  }
   0x1   :  { %v31_v0 = vld [vmem:[%s842_s0 + $0x8] sm:$0xff]  ;;  %v30_v1 = vld [vmem:[%s842_s0] sm:$0xff]  ;;  %v67_v3 = vld [vmem:[%s848_s6 + $0x18] sm:$0xff] }
   0x2   :  { %55 = vmatpush.msra.mxu0 %v31_v0  ;;  %v32_v2 = vld [vmem:[%s843_s1] sm:$0xff]  ;;  %v525_v4 = vld [vmem:[%s848_s6 + $0x38] sm:$0xff]  ;;  %87 = vmatpush.msra.mxu1 %v67_v3  ;;  %v66_v6 = vld [vmem:[%s848_s6 + $0x10] sm:$0xff] }
   0x3   :  { %115 = vmatpush.msra.mxu2 %v525_v4  ;;  %v537_v5 = vld [vmem:[%s848_s6 + $0x78] sm:$0xff]  ;;  %v524_v7 = vld [vmem:[%s848_s6 + $0x30] sm:$0xff]  ;;  %v65_v8 = vld [vmem:[%s848_s6 + $0x8] sm:$0xff]  ;;  %562 = vmatpush.msra.mxu3 %v67_v3 }
   0x4   :  { %56 = vmatpush.msra.mxu0 %v30_v1  ;;  %88 = vmatpush.msra.mxu1 %v66_v6  ;;  %v536_v9 = vld [vmem:[%s848_s6 + $0x70] sm:$0xff]  ;;  %v523_v10 = vld [vmem:[%s848_s6 + $0x28] sm:$0xff] }
   0x5   :  { %518 = vmatmul.msk.f32.vlgmr.msra.gmra.mxu0 %vm34_vm0, %v32_v2 }
   0x6   :  { %13 = vsyncpa [#allocation3], 0  ;;  %173 = vmatpush.msrb.mxu0 %v537_v5  ;;  %116 = vmatpush.msra.mxu2 %v524_v7  ;;  %v535_v11 = vld [vmem:[%s848_s6 + $0x68] sm:$0xff]  ;;  %v64_v13 = vld [vmem:[%s848_s6] sm:$0xff]  ;;  %vm68_vm1 = vcmask 261120   ;;  %s506_s15 = sshll.u32 %s850_s8, 4  ;;  %s507_s15 = int_to_ptr.hbm [resolvable:$true] %s506_s15 }
   0x7   :  { %89 = vmatpush.msra.mxu1 %v65_v8  ;;  %563 = vmatpush.msra.mxu3 %v66_v6  ;;  %v33_v12 = vld [vmem:[%s843_s1 + $0x8] sm:$0xff]  ;;  %v522_v14 = vld [vmem:[%s848_s6 + $0x20] sm:$0xff]  ;;  %v543_v16 = vld [vmem:[%s848_s6 + $0x98] sm:$0xff]  ;;  %s600_s16 = smov 128   ;;  %s601_s0 = smov 8  }
   0x8   :  { %174 = vmatpush.msrb.mxu0 %v536_v9  ;;  %117 = vmatpush.msra.mxu2 %v523_v10  ;;  %v534_v15 = vld [vmem:[%s848_s6 + $0x60] sm:$0xff]  ;;  %v542_v17 = vld [vmem:[%s848_s6 + $0x90] sm:$0xff]  ;;  %v541_v18 = vld [vmem:[%s848_s6 + $0x88] sm:$0xff] }
   0x9   :  { %564 = vmatpush.msra.mxu3 %v65_v8  ;;  %90 = vmatpush.msra.mxu1 %v64_v13  ;;  %v540_v19 = vld [vmem:[%s848_s6 + $0x80] sm:$0xff]  ;;  %v531_v20 = vld [vmem:[%s848_s6 + $0x58] sm:$0xff]  ;;  %v530_v21 = vld [vmem:[%s848_s6 + $0x50] sm:$0xff] }
   0xa   :  { %175 = vmatpush.msrb.mxu0 %v535_v11  ;;  %118 = vmatpush.msra.mxu2 %v522_v14  ;;  %v529_v22 = vld [vmem:[%s848_s6 + $0x48] sm:$0xff]  ;;  %v528_v23 = vld [vmem:[%s848_s6 + $0x40] sm:$0xff]  ;;  %v547_v30 = vld [vmem:[%s846_s4 + $0x18] sm:$0xff] }
   0xb   :  { %565 = vmatpush.msra.mxu3 %v64_v13  ;;  %203 = vmatpush.msrb.mxu1 %v543_v16  ;;  %v217_v29 = vld [vmem:[%s846_s4 + $0x8] sm:$0xff]  ;;  %v216_v31 = vld [vmem:[%s846_s4] sm:$0xff]  ;;  %v546_v32 = vld [vmem:[%s846_s4 + $0x10] sm:$0xff] }
   0xc   :  { %176 = vmatpush.msrb.mxu0 %v534_v15  ;;  %v352_v52 = vld [vmem:[%s847_s5 + $0x78] sm:$0xff]  ;;  %v351_v53 = vld [vmem:[%s847_s5 + $0x70] sm:$0xff]  ;;  %v350_v54 = vld [vmem:[%s847_s5 + $0x68] sm:$0xff] }
   0xd   :  { %519 = vmatmul.msk.f32.gmra.mxu0 %vm34_vm0, %v33_v12  ;;  %204 = vmatpush.msrb.mxu1 %v542_v17  ;;  %v349_v55 = vld [vmem:[%s847_s5 + $0x60] sm:$0xff]  ;;  %v348_v56 = vld [vmem:[%s847_s5 + $0x58] sm:$0xff]  ;;  %v347_v57 = vld [vmem:[%s847_s5 + $0x50] sm:$0xff] }
   0xe   :  { %145 = vmatpush.msrb.mxu3 %v531_v20  ;;  %v346_v58 = vld [vmem:[%s847_s5 + $0x48] sm:$0xff]  ;;  %v345_v59 = vld [vmem:[%s847_s5 + $0x40] sm:$0xff]  ;;  %v344_v60 = vld [vmem:[%s847_s5 + $0x38] sm:$0xff] }
   0xf   :  { %205 = vmatpush.msrb.mxu1 %v541_v18  ;;  %v343_v61 = vld [vmem:[%s847_s5 + $0x30] sm:$0xff]  ;;  %v342_v62 = vld [vmem:[%s847_s5 + $0x28] sm:$0xff]  ;;  %v214_v63 = vld [vmem:[%s845_s3] sm:$0xff] }
  0x10   :  { %146 = vmatpush.msrb.mxu3 %v530_v21  ;;  %v341_v0 = vld [vmem:[%s847_s5 + $0x20] sm:$0xff]  ;;  %v340_v5 = vld [vmem:[%s847_s5 + $0x18] sm:$0xff]  ;;  %v339_v6 = vld [vmem:[%s847_s5 + $0x10] sm:$0xff] }
  0x11   :  { %206 = vmatpush.msrb.mxu1 %v540_v19  ;;  %v215_v7 = vld [vmem:[%s845_s3 + $0x8] sm:$0xff]  ;;  %v337_v13 = vld [vmem:[%s847_s5] sm:$0xff]  ;;  %v412_v20 = vld [vmem:[%s849_s7 + $0x18] sm:$0xff] }
  0x12   :  { %147 = vmatpush.msrb.mxu3 %v529_v22  ;;  %v338_v12 = vld [vmem:[%s847_s5 + $0x8] sm:$0xff]  ;;  %v411_v21 = vld [vmem:[%s849_s7 + $0x10] sm:$0xff] }
  0x14   :  { %148 = vmatpush.msrb.mxu3 %v528_v23 }
  0x82   :  { %v58_v24 = vpop.f32.mrf.mxu0 }
  0x83   :  { %520 = vmatmul.msk.f32.vlgmr.msra.gmra.mxu1 %vm68_vm1, %v58_v24  ;;  %526 = vmatmul.msk.f32.vlgmr.msra.gmra.mxu2 %vm68_vm1, %v58_v24 }
  0x84   :  { %538 = vmatmul.msk.f32.vlgmr.msrb.gmra.mxu0 %vm68_vm1, %v58_v24 }
  0x8a   :  { %v61_v25 = vpop.f32.mrf.mxu0 }
  0x8b   :  { %521 = vmatmul.msk.f32.vlgmr.msra.gmra.mxu3 %vm68_vm1, %v61_v25  ;;  %527 = vmatmul.msk.f32.gmra.mxu2 %vm68_vm1, %v61_v25 }
  0x8c   :  { %539 = vmatmul.msk.f32.gmra.mxu0 %vm68_vm1, %v61_v25  ;;  %544 = vmatmul.msk.f32.vlgmr.msrb.gmra.mxu1 %vm68_vm1, %v58_v24 }
  0x93   :  { %532 = vmatmul.msk.f32.vlgmr.msrb.gmra.mxu3 %vm68_vm1, %v58_v24  ;;  %v376_v24 = vld [vmem:[%s844_s2] sm:$0xff] }
  0x94   :  { %545 = vmatmul.msk.f32.gmra.mxu1 %vm68_vm1, %v61_v25 }
  0x9b   :  { %533 = vmatmul.msk.f32.gmra.mxu3 %vm68_vm1, %v61_v25  ;;  %v377_v25 = vld [vmem:[%s844_s2 + $0x8] sm:$0xff] }
 0x100   :  { %v92_v26 = vpop.f32.mrf.mxu1 }
 0x101   :  { %v178_v36 = vpop.f32.mrf.mxu0 }
 0x106   :  { %v120_v46 = vpop.f32.mrf.mxu2 }
 0x107   :  { %v126_v49 = vmul.f32 %v120_v46, %v92_v26  ;;  %v410_v26 = vld [vmem:[%s849_s7 + $0x8] sm:$0xff] }
 0x109   :  { %v208_v27 = vpop.f32.mrf.mxu1  ;;  %v181_v40 = vpop.f32.mrf.mxu0 }
 0x10a   :  { %v275_v37 = vmul.f32 %v216_v31, %v208_v27  ;;  %v277_v38 = vmul.f32 %v546_v32, %v208_v27  ;;  %v409_v27 = vld [vmem:[%s849_s7] sm:$0xff] }
 0x10e   :  { %v95_v28 = vpop.f32.mrf.mxu3  ;;  %v123_v50 = vpop.f32.mrf.mxu2 }
 0x10f   :  { %v127_v51 = vmul.f32 %v123_v50, %v95_v28 }
 0x111   :  { %v211_v33 = vpop.f32.mrf.mxu1 }
 0x112   :  { %v276_v34 = vmul.f32 %v217_v29, %v211_v33  ;;  %v278_v35 = vmul.f32 %v547_v30, %v211_v33  ;;  %v558_v33 = vld [vmem:[%s849_s7 + $0x30] sm:$0xff] }
 0x114   :  { %299 = vmatpush.msra.mxu0 %v278_v35  ;;  %328 = vmatpush.msra.mxu1 %v276_v34  ;;  %v557_v34 = vld [vmem:[%s849_s7 + $0x28] sm:$0xff]  ;;  %v556_v35 = vld [vmem:[%s849_s7 + $0x20] sm:$0xff] }
 0x116   :  { %300 = vmatpush.msra.mxu0 %v277_v38  ;;  %329 = vmatpush.msra.mxu1 %v275_v37  ;;  %v150_v39 = vpop.f32.mrf.mxu3 }
 0x117   :  { %v184_v43 = vmul.f32 %v178_v36, %v150_v39 }
 0x118   :  { %431 = vmatpush.msrb.mxu0 %v412_v20 }
 0x119   :  { %v248_v47 = vmul.f32 %v546_v32, %v184_v43  ;;  %v221_v48 = vmul.f32 %v216_v31, %v184_v43  ;;  %v559_v32 = vld [vmem:[%s849_s7 + $0x38] sm:$0xff]  ;;  %s599_s7 = smov [#allocation2]  }
 0x11a   :  { %432 = vmatpush.msrb.mxu0 %v411_v21  ;;  %487 = vmatpush.msrb.mxu1 %v559_v32  ;;  %s504_s13 = sshll.u32 %s599_s7, 4  ;;  %s505_s13 = int_to_ptr.vmem [resolvable:$true] %s504_s13 }
 0x11c   :  { %433 = vmatpush.msrb.mxu0 %v410_v26  ;;  %488 = vmatpush.msrb.mxu1 %v558_v33 }
 0x11e   :  { %v153_v41 = vpop.f32.mrf.mxu3  ;;  %434 = vmatpush.msrb.mxu0 %v409_v27  ;;  %489 = vmatpush.msrb.mxu1 %v557_v34 }
 0x11f   :  { %v185_v42 = vmul.f32 %v181_v40, %v153_v41 }
 0x120   :  { %490 = vmatpush.msrb.mxu1 %v556_v35 }
 0x121   :  { %v249_v44 = vmul.f32 %v547_v30, %v185_v42  ;;  %v222_v45 = vmul.f32 %v217_v29, %v185_v42 }
 0x123   :  { %237 = vmatpush.xpose.msrb.mxu2 %v222_v45  ;;  %264 = vmatpush.xpose.msra.mxu3 %v249_v44 }
 0x127   :  { %238 = vmatpush.xpose.msrb.mxu2 %v221_v48  ;;  %265 = vmatpush.xpose.msra.mxu3 %v248_v47 }
 0x12a   :  { %239 = vmatmul.f32.vlgmr.msrb.gmra.mxu2 %v126_v49  ;;  %266 = vmatmul.f32.vlgmr.msra.gmra.mxu3 %v126_v49 }
 0x12b   :  { %353 = vmatpush.msra.mxu2 %v352_v52 }
 0x12d   :  { %354 = vmatpush.msra.mxu2 %v351_v53 }
 0x12f   :  { %355 = vmatpush.msra.mxu2 %v350_v54 }
 0x131   :  { %356 = vmatpush.msra.mxu2 %v349_v55 }
 0x132   :  { %242 = vmatmul.f32.gmra.mxu2 %v127_v51  ;;  %269 = vmatmul.f32.gmra.mxu3 %v127_v51 }
 0x133   :  { %357 = vmatpush.msra.mxu2 %v348_v56 }
 0x135   :  { %358 = vmatpush.msra.mxu2 %v347_v57 }
 0x137   :  { %359 = vmatpush.msra.mxu2 %v346_v58 }
 0x139   :  { %360 = vmatpush.msra.mxu2 %v345_v59 }
 0x13b   :  { %361 = vmatpush.msra.mxu2 %v344_v60 }
 0x13d   :  { %362 = vmatpush.msra.mxu2 %v343_v61 }
 0x13f   :  { %363 = vmatpush.msra.mxu2 %v342_v62 }
 0x141   :  { %364 = vmatpush.msra.mxu2 %v341_v0 }
 0x143   :  { %365 = vmatpush.msra.mxu2 %v340_v5 }
 0x145   :  { %366 = vmatpush.msra.mxu2 %v339_v6 }
 0x147   :  { %367 = vmatpush.msra.mxu2 %v338_v12 }
 0x149   :  { %368 = vmatpush.msra.mxu2 %v337_v13 }
 0x1ad   :  { %v240_v1 = vpop.f32.mrf.mxu2  ;;  %v267_v2 = vpop.f32.mrf.mxu3 }
 0x1ae   :  { %v246_v3 = vmul.f32 %v240_v1, %v214_v63  ;;  %v273_v4 = vmul.f32 %v267_v2, %v214_v63 }
 0x1b0   :  { %548 = vmatmul.msk.f32.vlgmr.msra.gmra.mxu0 %vm34_vm0, %v273_v4  ;;  %550 = vmatmul.msk.f32.vlgmr.msra.gmra.mxu1 %vm34_vm0, %v246_v3 }
 0x1b5   :  { %v243_v8 = vpop.f32.mrf.mxu2  ;;  %v270_v9 = vpop.f32.mrf.mxu3 }
 0x1b6   :  { %v247_v10 = vmul.f32 %v243_v8, %v215_v7  ;;  %v274_v11 = vmul.f32 %v270_v9, %v215_v7 }
 0x1b8   :  { %549 = vmatmul.msk.f32.gmra.mxu0 %vm34_vm0, %v274_v11  ;;  %551 = vmatmul.msk.f32.gmra.mxu1 %vm34_vm0, %v247_v10 }
 0x22d   :  { %v302_v14 = vpop.f32.mrf.mxu0  ;;  %v331_v15 = vpop.f32.mrf.mxu1 }
 0x22e   :  { %v332_v16 = vadd.f32 %v331_v15, %v302_v14 }
 0x230   :  { %369 = vmatmul.f32.vlgmr.msra.gmra.mxu2 %v332_v16 }
 0x235   :  { %v305_v17 = vpop.f32.mrf.mxu0  ;;  %v334_v18 = vpop.f32.mrf.mxu1 }
 0x236   :  { %v335_v19 = vadd.f32 %v334_v18, %v305_v17 }
 0x238   :  { %372 = vmatmul.f32.gmra.mxu2 %v335_v19 }
 0x2b3   :  { %v370_v22 = vpop.f32.mrf.mxu2 }
 0x2bb   :  { %v373_v23 = vpop.f32.mrf.mxu2 }
 0x2bc   :  { %398 = vmatpush.msrb.mxu3 %v373_v23 }
 0x2be   :  { %399 = vmatpush.msrb.mxu3 %v370_v22 }
 0x2bf   :  { %552 = vmatmul.msk.f32.vlgmr.msrb.gmra.mxu3 %vm34_vm0, %v376_v24 }
 0x2c7   :  { %553 = vmatmul.msk.f32.gmra.mxu3 %vm34_vm0, %v377_v25 }
 0x342   :  { %v401_v28 = vpop.f32.mrf.mxu3 }
 0x343   :  { %v407_v29 = vmul.f32 %v401_v28, %v401_v28 }
 0x345   :  { %554 = vmatmul.msk.f32.vlgmr.msrb.gmra.mxu0 %vm68_vm1, %v407_v29 }
 0x34a   :  { %v404_v30 = vpop.f32.mrf.mxu3 }
 0x34b   :  { %v408_v31 = vmul.f32 %v404_v30, %v404_v30 }
 0x34d   :  { %555 = vmatmul.msk.f32.gmra.mxu0 %vm68_vm1, %v408_v31 }
 0x3c2   :  { %v436_v36 = vpop.f32.mrf.mxu0 }
 0x3c3   :  { %v437_v37 = vadd.f32 1e-05, %v436_v36 }
 0x3c5   :  { %569 = vrsqrt.f32 %v437_v37  ;;  %vm448_vm3 = vweird.f32 %v437_v37 }
 0x3ca   :  { %v439_v38 = vpop.f32.mrf.mxu0 }
 0x3cb   :  { %v570_v39 = vpop.eup %569  ;;  %v440_v40 = vadd.f32 1e-05, %v439_v38 }
 0x3cc   :  { %v443_v41 = vmul.f32 %v570_v39, %v437_v37  ;;  %vm449_vm2 = vweird.f32 %v570_v39 }
 0x3cd   :  { %571 = vrsqrt.f32 %v440_v40  ;;  %vm450_vm4 = vmor %vm448_vm3, %vm449_vm2  ;;  %vm458_vm6 = vweird.f32 %v440_v40 }
 0x3ce   :  { %v444_v42 = vmul.f32 %v570_v39, %v443_v41 }
 0x3d0   :  { %v445_v43 = vmul.f32 0.5, %v444_v42 }
 0x3d2   :  { %v446_v44 = vsub.f32 1.5, %v445_v43 }
 0x3d3   :  { %v572_v45 = vpop.eup %571 }
 0x3d4   :  { %v447_v46 = vmul.f32 %v570_v39, %v446_v44  ;;  %v453_v47 = vmul.f32 %v572_v45, %v440_v40  ;;  %vm459_vm5 = vweird.f32 %v572_v45 }
 0x3d5   :  { %vm460_vm7 = vmor %vm458_vm6, %vm459_vm5 }
 0x3d6   :  { %v451_v48 = vsel %vm450_vm4, %v570_v39, %v447_v46  ;;  %v454_v49 = vmul.f32 %v572_v45, %v453_v47 }
 0x3d7   :  { %v462_v50 = vmul.f32 %v451_v48, %v401_v28 }
 0x3d8   :  { %v455_v51 = vmul.f32 0.5, %v454_v49 }
 0x3d9   :  { %560 = vmatmul.msk.f32.vlgmr.msrb.gmra.mxu1 %vm68_vm1, %v462_v50 }
 0x3da   :  { %v456_v52 = vsub.f32 1.5, %v455_v51 }
 0x3dc   :  { %v457_v53 = vmul.f32 %v572_v45, %v456_v52 }
 0x3de   :  { %v461_v54 = vsel %vm460_vm7, %v572_v45, %v457_v53 }
 0x3df   :  { %v463_v55 = vmul.f32 %v461_v54, %v404_v30 }
 0x3e1   :  { %561 = vmatmul.msk.f32.gmra.mxu1 %vm68_vm1, %v463_v55 }
 0x456   :  { %v492_v56 = vpop.f32.mrf.mxu1 }
 0x457   :  { %498 = vst.msk [vmem:[#allocation2] sm:$0xff] %vm68_vm1, %v492_v56 }
 0x45e   :  { %v495_v57 = vpop.f32.mrf.mxu1 }
 0x45f   :  { %499 = vst.msk [vmem:[#allocation2 + $0x8] sm:$0xff] %vm68_vm1, %v495_v57 }
 0x460   :  { %512 = dma.vmem_to_hbm [thread:$0]  %s505_s13, 256, %s507_s15, [#allocation3], %s600_s16, %s600_s16, %s601_s0  }
 0x461   :  { %597 = dma.done.wait [#allocation3], 256  }
 0x462   :  { %598 = vsyncadd [#allocation3], 4294967040 }
 0x463   :  { %517 = vsyncpa [#allocation3], 1 }

</bundles_post_ra>
